<compile_context>
chip_gen: v5e
topology: v5e:2x2
jax: 0.10.0
libtpu: 0.0.40
codegen_flags: <defaults>
</compile_context>

<pallas_src>
import jax
import jax.numpy as jnp
import numpy as np
from jax.experimental import pallas as pl
from jax.experimental.pallas import tpu as pltpu


def _copy_kernel(x_ref, o_ref):
    # Pure pass-through: load the current VMEM tile and store it unchanged.
    o_ref[...] = x_ref[...]


def ensemble_forward(x):
    """Identity forward of Ensemble, computed via a tiled Pallas TPU copy."""
    orig_shape = x.shape
    orig_dtype = x.dtype
    n = x.size
    if n == 0:
        return x

    flat = x.reshape(-1)

    # Pack sub-32-bit dtypes into uint32 words: fewer vld/vst ops, same bytes.
    itemsize = np.dtype(orig_dtype).itemsize
    packed = False
    if itemsize < 4 and (n % (4 // itemsize)) == 0:
        ratio = 4 // itemsize
        flat = jax.lax.bitcast_convert_type(
            flat.reshape(-1, ratio), jnp.uint32
        )
        packed = True

    work_dtype = flat.dtype
    work_itemsize = np.dtype(work_dtype).itemsize
    n_work = flat.size

    # Lane-dense slab: wide last dim (multiple of 128) for long DMA bursts.
    COLS = 1024
    pad = (-n_work) % COLS
    if pad:
        flat = jnp.pad(flat, (0, pad))
    rows = flat.size // COLS
    x2d = flat.reshape(rows, COLS)

    # Row tile: ~2 MiB per f32 tile -> 4 double-buffered copies ≈ 8 MiB VMEM,
    # safe under the default scoped limit on v5e/v6e/v7x.
    TR = 512 if rows >= 512 else rows
    grid = (pl.cdiv(rows, TR),)

    bytes_accessed = 2 * rows * COLS * work_itemsize

    out2d = pl.pallas_call(
        _copy_kernel,
        out_shape=jax.ShapeDtypeStruct((rows, COLS), work_dtype),
        grid_spec=pltpu.PrefetchScalarGridSpec(
            num_scalar_prefetch=0,
            grid=grid,
            in_specs=[pl.BlockSpec((TR, COLS), lambda i: (i, 0))],
            out_specs=pl.BlockSpec((TR, COLS), lambda i: (i, 0)),
        ),
        compiler_params=pltpu.CompilerParams(
            # Each grid step is independent -> shard across both TCs on v7x.
            dimension_semantics=("parallel",),
        ),
        cost_estimate=pl.CostEstimate(
            flops=0, transcendentals=0, bytes_accessed=bytes_accessed
        ),
    )(x2d)

    out_flat = out2d.reshape(-1)
    if pad:
        out_flat = out_flat[:n_work]
    if packed:
        out_flat = jax.lax.bitcast_convert_type(out_flat, orig_dtype).reshape(-1)
    return out_flat.reshape(orig_shape)


if __name__ == "__main__":
    # The sub-models (model1..model4) are unused in forward; no parameters
    # are needed for the identity pass. Shapes follow a typical NCHW input.
    key = jax.random.PRNGKey(0)
    x = jax.random.normal(key, (2, 4, 16, 16), dtype=jnp.float32)

    y = ensemble_forward(x)
    y = jax.block_until_ready(y)

    assert y.shape == x.shape and y.dtype == x.dtype
    assert bool(jnp.all(y == x))

    # Also exercise the padding path (non-128-divisible element count) and the
    # sub-32-bit packing path, to confirm both stay bit-exact.
    x_odd = jax.random.normal(jax.random.PRNGKey(1), (3, 5, 7), dtype=jnp.float32)
    y_odd = jax.block_until_ready(ensemble_forward(x_odd))
    assert y_odd.shape == x_odd.shape and bool(jnp.all(y_odd == x_odd))

    x_bf16 = jax.random.normal(jax.random.PRNGKey(2), (2, 4, 16, 16)).astype(jnp.bfloat16)
    y_bf16 = jax.block_until_ready(ensemble_forward(x_bf16))
    assert y_bf16.dtype == jnp.bfloat16 and bool(jnp.all(y_bf16 == x_bf16))

    print("KERNEL_OK")
</pallas_src>

<mosaic_0001>
module attributes {stable_mosaic.version = 11 : i64} {
  func.func @_copy_kernel(%arg0: i32, %arg1: memref<2x1024xf32, #tpu.memory_space<vmem>>, %arg2: memref<2x1024xf32, #tpu.memory_space<vmem>>) attributes {dimension_semantics = [#tpu.dimension_semantics<parallel>], iteration_bounds = array<i64: 1>, scalar_prefetch = 0 : i64, scratch_operands = 0 : i64, tpu.core_type = #tpu.core_type<tc>, window_params = [{transform_indices = @transform_0, window_bounds = array<i64: 2, 1024>}, {transform_indices = @transform_1, window_bounds = array<i64: 2, 1024>}]} {
    %c0 = arith.constant 0 : index
    %c0_0 = arith.constant 0 : index
    %0 = vector.load %arg1[%c0, %c0_0] : memref<2x1024xf32, #tpu.memory_space<vmem>>, vector<2x1024xf32>
    %c0_1 = arith.constant 0 : index
    %c0_2 = arith.constant 0 : index
    %1 = vector.load %arg2[%c0_1, %c0_2] : memref<2x1024xf32, #tpu.memory_space<vmem>>, vector<2x1024xf32>
    tpu.vector_store %arg2[%c0_1, %c0_2], %0 {strides = array<i32>} : memref<2x1024xf32, #tpu.memory_space<vmem>>, vector<2x1024xf32>,
    return
  }
  func.func @transform_0(%arg0: i32) -> (i32, i32) {
    %c0_i32 = arith.constant 0 : i32
    %c0_i32_0 = arith.constant 0 : i32
    return %arg0, %c0_i32 : i32, i32
  }
  func.func @transform_1(%arg0: i32) -> (i32, i32) {
    %c0_i32 = arith.constant 0 : i32
    %c0_i32_0 = arith.constant 0 : i32
    return %arg0, %c0_i32 : i32, i32
  }
}

</mosaic_0001>

<bundles_post_ra>
// kernel: tpu_custom_call.1
= control target key start
LH: loop header
LB: loop body
LE: loop exit
PB: predicated region body
PF: predicated region fallthrough
CT: control target
= control target key end

     0   :  { %6 = vsyncpa [#allocation3], 0  ;;  %s116_s0 = inlined_call_operand.hbm [shape: f32[2,1024], index: 0, kind: input, shape index: {}]   ;;  %s117_s1 = inlined_call_operand.hbm [shape: f32[2,1024], index: 1, kind: output, shape index: {}]  }
   0x1   :  { %7 = vsyncpa [#allocation4], 0  ;;  %s13_s8 = sshll.u32 %s116_s0, 4  ;;  %s98_s9 = smov [#allocation2]   ;;  %s14_s8 = int_to_ptr.hbm [resolvable:$true] %s13_s8 }
   0x2   :  { %s15_s10 = sshll.u32 %s98_s9, 4  ;;  %s16_s10 = int_to_ptr.vmem [resolvable:$true] %s15_s10 }
   0x3   :  { %18 = dma.hbm_to_vmem [thread:$0]  %s14_s8, 256, %s16_s10, [#allocation3]  }
   0x4   :  { %94 = dma.done.wait [#allocation3], 256  }
   0x5   :  { %95 = vsyncadd [#allocation3], 4294967040  ;;  %s99_s11 = smov [#allocation5]   ;;  %s34_s15 = sshll.u32 %s117_s1, 4  ;;  %v23_v0 = vld [vmem:[#allocation2] sm:$0xff]  ;;  %v24_v1 = vld [vmem:[#allocation2 + $0x8] sm:$0xff]  ;;  %s35_s15 = int_to_ptr.hbm [resolvable:$true] %s34_s15 }
   0x6   :  { %s32_s12 = sshll.u32 %s99_s11, 4  ;;  %25 = vst [vmem:[#allocation5] sm:$0xff] %v23_v0  ;;  %s33_s12 = int_to_ptr.vmem [resolvable:$true] %s32_s12 }
   0x7   :  { %26 = vst [vmem:[#allocation5 + $0x8] sm:$0xff] %v24_v1 }
   0x8   :  { %37 = dma.vmem_to_hbm [thread:$0]  %s33_s12, 256, %s35_s15, [#allocation4]  }
   0x9   :  { %96 = dma.done.wait [#allocation4], 256  }
   0xa   :  { %97 = vsyncadd [#allocation4], 4294967040 }
   0xb   :  { %42 = vsyncpa [#allocation3], 1 }
   0xc   :  { %43 = vsyncpa [#allocation4], 1 }

</bundles_post_ra>
